<compile_context>
chip_gen: v6e
topology: v6e:2x2x1
jax: 0.10.0
libtpu: 0.0.40
codegen_flags: <defaults>
</compile_context>

<pallas_src>
import functools

import jax
import jax.numpy as jnp
from jax.experimental import pallas as pl
from jax.experimental.pallas import tpu as pltpu

_LANE = 128        # vreg lane width: weight out/in dims padded to multiples of this
_SUBLANE = 8       # vreg sublane width: batch tiles are multiples of this
_MAX_BLOCK_B = 512 # batch-tile cap (per-step overhead ~0.35 us; 512+ rows ~ roofline)


def _round_up(x, m):
    return (x + m - 1) // m * m


def _cdiv(a, b):
    return -(-a // b)


def _pick_block_b(B):
    """Batch tile: one full tile up to 512 rows, else ~even ~512-row tiles.

    Large batches naturally get >= 2 grid steps, which lets v7x's two
    TensorCores split the "parallel" batch axis; on single-TC chips the extra
    steps cost only the tiny per-step overhead.
    """
    b8 = _round_up(B, _SUBLANE)
    if b8 <= _MAX_BLOCK_B:
        return b8
    n_tiles = _cdiv(b8, _MAX_BLOCK_B)
    return _round_up(_cdiv(b8, n_tiles), _SUBLANE)


def _stable_softplus(x):
    # matches torch.nn.Softplus(beta=1): log(1 + exp(x)), numerically stable.
    return jnp.maximum(x, 0.0) + jnp.log1p(jnp.exp(-jnp.abs(x)))


def _head_kernel(num_hidden, out_channels, x_ref, *refs):
    """Fused Head_net forward for one batch tile.

    refs = [w0, b0, ..., w_{nh-1}, b_{nh-1}, w_head, b_head, out]
    where w_head/b_head are the mu|std concatenation.  Weights are
    PyTorch-layout (out_features, in_features); we contract the last dim of
    both operands (transposed-RHS matmul, native on the MXU).  Weights may be
    bf16 (v6e/v7x fast path); accumulation and elementwise math stay f32.
    """
    out_ref = refs[-1]
    p = refs[:-1]
    dn = (((1,), (1,)), ((), ()))   # (tile_b, K) x (N, K) -> (tile_b, N)

    h = x_ref[...]
    for l in range(num_hidden):
        w, b = p[2 * l][...], p[2 * l + 1][...]
        if h.dtype != w.dtype:
            h = h.astype(w.dtype)                 # bf16 MXU operands if requested
        h = jax.lax.dot_general(h, w, dn, preferred_element_type=jnp.float32) + b
        h = jnp.maximum(h, 0.0)                   # hidden_unit activation = F.relu

    w_h, b_h = p[2 * num_hidden][...], p[2 * num_hidden + 1][...]
    if h.dtype != w_h.dtype:
        h = h.astype(w_h.dtype)
    y = jax.lax.dot_general(h, w_h, dn, preferred_element_type=jnp.float32) + b_h

    # lanes [0, oc) = mu, [oc, 2*oc) = std -> softplus + 1e-5 only on std lanes
    lane = jax.lax.broadcasted_iota(jnp.int32, y.shape, 1)
    is_std = (lane >= out_channels) & (lane < 2 * out_channels)
    out_ref[...] = jnp.where(is_std, 1e-05 + _stable_softplus(y), y).astype(out_ref.dtype)


def prepare_head_params(raw_params, matmul_dtype=jnp.float32):
    """One-time parameter prep (NOT per forward call).

    raw_params = [(W, b) for each final_unit ..., (W_mu, b_mu), (W_std, b_std)]
    in PyTorch (out_features, in_features) layout.

    * W_mu / W_std (and biases) are concatenated along out-features so the
      final layer is a single matmul.
    * Out-feature dims (and in-feature dims of all layers after the first)
      are zero-padded to 128-lane multiples so contractions / stores are
      lane-dense.  The FIRST layer's in-dim is left unpadded so `x` can be
      passed without a column-pad pass.  Padded rows/cols are zero and
      contribute exactly 0 end to end.
    * `matmul_dtype=jnp.bfloat16` casts weights for the v6e/v7x MXU fast
      path; biases stay f32 (added to the f32 accumulator).
    """
    *hidden, (w_mu, b_mu), (w_std, b_std) = raw_params
    w_head = jnp.concatenate([w_mu, w_std], axis=0)
    b_head = jnp.concatenate([b_mu, b_std], axis=0)
    layers = list(hidden) + [(w_head, b_head)]

    padded = []
    for idx, (w, b) in enumerate(layers):
        oc, ic = w.shape
        op = _round_up(oc, _LANE)
        ip = ic if idx == 0 else _round_up(ic, _LANE)
        w_p = jnp.zeros((op, ip), matmul_dtype).at[:oc, :ic].set(w.astype(matmul_dtype))
        b_p = jnp.zeros((1, op), jnp.float32).at[0, :oc].set(b.astype(jnp.float32))
        padded.append((w_p, b_p))
    return padded


@functools.partial(jax.jit, static_argnames=("out_channels",))
def head_net_forward(x, params, *, out_channels):
    """(mu, std) = Head_net.forward given features = self.net(x).

    x:      (B, in_channels) — output features of the backbone `net`.
    params: prepare_head_params(raw PyTorch-layout params)
    """
    # TODO(synk): the backbone `self.net(x)` is an external, unspecified module;
    # `x` here is taken to be its output features.
    B, C_in = x.shape
    if C_in != params[0][0].shape[1]:
        raise ValueError("x feature dim does not match first layer weight")

    num_hidden = len(params) - 1                      # last entry is the fused mu|std head
    head_pad = params[-1][0].shape[0]                 # >= round_up(2*out_channels, 128)

    block_b = _pick_block_b(B)
    B_pad = _round_up(B, block_b)

    x = x.astype(jnp.float32)                         # pin compute/output dtype
    x_p = x if B_pad == B else jnp.pad(x, ((0, B_pad - B), (0, 0)))

    flat_params = [a for wb in params for a in wb]

    in_specs = [pl.BlockSpec((block_b, C_in), lambda i: (i, 0))]
    for w, b in params:
        # Constant index_map: whole (padded) weight/bias stays resident in VMEM
        # across grid steps.  (For very wide heads on v7x, tile the out-feature
        # dim with an extra grid axis and/or use pl.Buffered(1) here.)
        in_specs.append(pl.BlockSpec(w.shape, lambda i: (0, 0)))
        in_specs.append(pl.BlockSpec(b.shape, lambda i: (0, 0)))

    out = pl.pallas_call(
        functools.partial(_head_kernel, num_hidden, out_channels),
        out_shape=jax.ShapeDtypeStruct((B_pad, head_pad), jnp.float32),
        grid_spec=pltpu.PrefetchScalarGridSpec(
            num_scalar_prefetch=0,
            grid=(B_pad // block_b,),
            in_specs=in_specs,
            out_specs=pl.BlockSpec((block_b, head_pad), lambda i: (i, 0)),
        ),
        compiler_params=pltpu.CompilerParams(
            dimension_semantics=("parallel",)),
    )(x_p, *flat_params)

    mu = out[:B, :out_channels]
    std = out[:B, out_channels:2 * out_channels]
    return mu, std


def reference_forward(x, raw_params):
    h = x
    for w, b in raw_params[:-2]:
        h = jnp.maximum(h @ w.T + b, 0.0)
    w_mu, b_mu = raw_params[-2]
    w_std, b_std = raw_params[-1]
    mu = h @ w_mu.T + b_mu
    s = h @ w_std.T + b_std
    return mu, 1e-05 + jnp.logaddexp(s, 0.0)


if __name__ == "__main__":
    key = jax.random.PRNGKey(0)

    in_channels = 32          # out_features of the backbone's last hidden_unit
    final_layers = [64, 32]   # widths of Head_net.final_units
    out_channels = 4          # mu / std output width

    layer_dims = [in_channels] + final_layers
    n_keys = 2 + 2 * (len(final_layers) + 2)
    keys = jax.random.split(key, n_keys)
    k_x, k_x2, k_params = keys[0], keys[1], keys[2:]

    def make_linear(kw, kb, fan_out, fan_in):
        # nn.init.normal_(weight, std=0.15); nn.Linear default uniform bias init.
        w = 0.15 * jax.random.normal(kw, (fan_out, fan_in), dtype=jnp.float32)
        bound = 1.0 / jnp.sqrt(fan_in)
        b = jax.random.uniform(kb, (fan_out,), dtype=jnp.float32,
                               minval=-bound, maxval=bound)
        return w, b

    raw_params = []
    ki = 0
    for fan_in, fan_out in zip(layer_dims[:-1], layer_dims[1:]):
        raw_params.append(make_linear(k_params[ki], k_params[ki + 1], fan_out, fan_in))
        ki += 2
    prev = layer_dims[-1]
    raw_params.append(make_linear(k_params[ki], k_params[ki + 1], out_channels, prev))      # mu
    raw_params.append(make_linear(k_params[ki + 2], k_params[ki + 3], out_channels, prev))  # std

    # --- f32 path, small batch -------------------------------------------------
    params_f32 = prepare_head_params(raw_params)             # one-time prep
    B = 8
    x = jax.random.normal(k_x, (B, in_channels), dtype=jnp.float32)
    mu, std = jax.block_until_ready(
        head_net_forward(x, params_f32, out_channels=out_channels))
    mu_ref, std_ref = reference_forward(x, raw_params)
    assert mu.shape == (B, out_channels) and std.shape == (B, out_channels)
    assert jnp.allclose(mu, mu_ref, atol=1e-4, rtol=1e-4)
    assert jnp.allclose(std, std_ref, atol=1e-4, rtol=1e-4)
    assert bool(jnp.all(std > 0.0))

    # --- f32 path, batch not a multiple of 8 (exercises row padding) -----------
    B2 = 300
    x2 = jax.random.normal(k_x2, (B2, in_channels), dtype=jnp.float32)
    mu2, std2 = jax.block_until_ready(
        head_net_forward(x2, params_f32, out_channels=out_channels))
    mu2_ref, std2_ref = reference_forward(x2, raw_params)
    assert mu2.shape == (B2, out_channels) and std2.shape == (B2, out_channels)
    assert jnp.allclose(mu2, mu2_ref, atol=1e-4, rtol=1e-4)
    assert jnp.allclose(std2, std2_ref, atol=1e-4, rtol=1e-4)

    # --- bf16 MXU-operand path (v6e/v7x fast path), f32 accumulation -----------
    params_bf16 = prepare_head_params(raw_params, matmul_dtype=jnp.bfloat16)
    mu_b, std_b = jax.block_until_ready(
        head_net_forward(x, params_bf16, out_channels=out_channels))
    assert mu_b.shape == (B, out_channels) and std_b.shape == (B, out_channels)
    assert jnp.allclose(mu_b, mu_ref, atol=5e-2, rtol=5e-2)
    assert jnp.allclose(std_b, std_ref, atol=5e-2, rtol=5e-2)
    assert bool(jnp.all(std_b > 0.0))

    print("KERNEL_OK")
</pallas_src>

<mosaic_0001>
module attributes {stable_mosaic.version = 11 : i64} {
  func.func @_head_kernel(%arg0: i32, %arg1: memref<8x32xf32, #tpu.memory_space<vmem>>, %arg2: memref<128x32xf32, #tpu.memory_space<vmem>>, %arg3: memref<1x128xf32, #tpu.memory_space<vmem>>, %arg4: memref<128x128xf32, #tpu.memory_space<vmem>>, %arg5: memref<1x128xf32, #tpu.memory_space<vmem>>, %arg6: memref<128x128xf32, #tpu.memory_space<vmem>>, %arg7: memref<1x128xf32, #tpu.memory_space<vmem>>, %arg8: memref<8x128xf32, #tpu.memory_space<vmem>>) attributes {dimension_semantics = [#tpu.dimension_semantics<parallel>], iteration_bounds = array<i64: 1>, scalar_prefetch = 0 : i64, scratch_operands = 0 : i64, tpu.core_type = #tpu.core_type<tc>, window_params = [{transform_indices = @transform_0, window_bounds = array<i64: 8, 32>}, {pipeline_mode = #tpu.pipeline_mode<synchronous>, transform_indices = @transform_1, window_bounds = array<i64: 128, 32>}, {pipeline_mode = #tpu.pipeline_mode<synchronous>, transform_indices = @transform_2, window_bounds = array<i64: 1, 128>}, {pipeline_mode = #tpu.pipeline_mode<synchronous>, transform_indices = @transform_3, window_bounds = array<i64: 128, 128>}, {pipeline_mode = #tpu.pipeline_mode<synchronous>, transform_indices = @transform_4, window_bounds = array<i64: 1, 128>}, {pipeline_mode = #tpu.pipeline_mode<synchronous>, transform_indices = @transform_5, window_bounds = array<i64: 128, 128>}, {pipeline_mode = #tpu.pipeline_mode<synchronous>, transform_indices = @transform_6, window_bounds = array<i64: 1, 128>}, {transform_indices = @transform_7, window_bounds = array<i64: 8, 128>}]} {
    %c0 = arith.constant 0 : index
    %c0_0 = arith.constant 0 : index
    %0 = vector.load %arg1[%c0, %c0_0] : memref<8x32xf32, #tpu.memory_space<vmem>>, vector<8x32xf32>
    %c0_1 = arith.constant 0 : index
    %c0_2 = arith.constant 0 : index
    %1 = vector.load %arg2[%c0_1, %c0_2] : memref<128x32xf32, #tpu.memory_space<vmem>>, vector<128x32xf32>
    %c0_3 = arith.constant 0 : index
    %c0_4 = arith.constant 0 : index
    %2 = vector.load %arg3[%c0_3, %c0_4] : memref<1x128xf32, #tpu.memory_space<vmem>>, vector<1x128xf32>
    %cst = arith.constant dense<0.000000e+00> : vector<8x128xf32>
    %3 = tpu.matmul %0, %1, %cst {dimension_numbers = #tpu.dot_dimension_numbers<[1], [1], [0], [0], [0, 0, 1, 0], [], []>} : vector<8x32xf32>, vector<128x32xf32>, vector<8x128xf32> -> vector<8x128xf32>
    %4 = vector.broadcast %2 : vector<1x128xf32> to vector<8x128xf32>
    %5 = arith.addf %3, %4 : vector<8x128xf32>
    %cst_5 = arith.constant 0.000000e+00 : f32
    %6 = vector.broadcast %cst_5 : f32 to vector<8x128xf32>
    %7 = arith.maximumf %5, %6 : vector<8x128xf32>
    %c0_6 = arith.constant 0 : index
    %c0_7 = arith.constant 0 : index
    %8 = vector.load %arg4[%c0_6, %c0_7] : memref<128x128xf32, #tpu.memory_space<vmem>>, vector<128x128xf32>
    %c0_8 = arith.constant 0 : index
    %c0_9 = arith.constant 0 : index
    %9 = vector.load %arg5[%c0_8, %c0_9] : memref<1x128xf32, #tpu.memory_space<vmem>>, vector<1x128xf32>
    %cst_10 = arith.constant dense<0.000000e+00> : vector<8x128xf32>
    %10 = tpu.matmul %7, %8, %cst_10 {dimension_numbers = #tpu.dot_dimension_numbers<[1], [1], [0], [0], [0, 0, 1, 0], [], []>} : vector<8x128xf32>, vector<128x128xf32>, vector<8x128xf32> -> vector<8x128xf32>
    %11 = vector.broadcast %9 : vector<1x128xf32> to vector<8x128xf32>
    %12 = arith.addf %10, %11 : vector<8x128xf32>
    %cst_11 = arith.constant 0.000000e+00 : f32
    %13 = vector.broadcast %cst_11 : f32 to vector<8x128xf32>
    %14 = arith.maximumf %12, %13 : vector<8x128xf32>
    %c0_12 = arith.constant 0 : index
    %c0_13 = arith.constant 0 : index
    %15 = vector.load %arg6[%c0_12, %c0_13] : memref<128x128xf32, #tpu.memory_space<vmem>>, vector<128x128xf32>
    %c0_14 = arith.constant 0 : index
    %c0_15 = arith.constant 0 : index
    %16 = vector.load %arg7[%c0_14, %c0_15] : memref<1x128xf32, #tpu.memory_space<vmem>>, vector<1x128xf32>
    %cst_16 = arith.constant dense<0.000000e+00> : vector<8x128xf32>
    %17 = tpu.matmul %14, %15, %cst_16 {dimension_numbers = #tpu.dot_dimension_numbers<[1], [1], [0], [0], [0, 0, 1, 0], [], []>} : vector<8x128xf32>, vector<128x128xf32>, vector<8x128xf32> -> vector<8x128xf32>
    %18 = vector.broadcast %16 : vector<1x128xf32> to vector<8x128xf32>
    %19 = arith.addf %17, %18 : vector<8x128xf32>
    %20 = tpu.iota {dimensions = array<i32: 1>} : vector<8x128xi32>
    %c4_i32 = arith.constant 4 : i32
    %21 = vector.broadcast %c4_i32 : i32 to vector<8x128xi32>
    %22 = arith.cmpi sge, %20, %21 : vector<8x128xi32>
    %c8_i32 = arith.constant 8 : i32
    %23 = vector.broadcast %c8_i32 : i32 to vector<8x128xi32>
    %24 = arith.cmpi slt, %20, %23 : vector<8x128xi32>
    %25 = arith.andi %22, %24 : vector<8x128xi1>
    %cst_17 = arith.constant 0.000000e+00 : f32
    %26 = vector.broadcast %cst_17 : f32 to vector<8x128xf32>
    %27 = arith.maximumf %19, %26 : vector<8x128xf32>
    %28 = math.absf %19 : vector<8x128xf32>
    %cst_18 = arith.constant 0.000000e+00 : f32
    %29 = vector.broadcast %cst_18 : f32 to vector<8x128xf32>
    %30 = arith.subf %29, %28 : vector<8x128xf32>
    %31 = math.exp %30 : vector<8x128xf32>
    %32 = math.log1p %31 : vector<8x128xf32>
    %33 = arith.addf %27, %32 : vector<8x128xf32>
    %cst_19 = arith.constant 9.99999974E-6 : f32
    %34 = vector.broadcast %cst_19 : f32 to vector<8x128xf32>
    %35 = arith.addf %34, %33 : vector<8x128xf32>
    %36 = arith.select %25, %35, %19 : vector<8x128xi1>, vector<8x128xf32>
    %c0_20 = arith.constant 0 : index
    %c0_21 = arith.constant 0 : index
    %37 = vector.load %arg8[%c0_20, %c0_21] : memref<8x128xf32, #tpu.memory_space<vmem>>, vector<8x128xf32>
    tpu.vector_store %arg8[%c0_20, %c0_21], %36 {strides = array<i32>} : memref<8x128xf32, #tpu.memory_space<vmem>>, vector<8x128xf32>,
    return
  }
  func.func @transform_0(%arg0: i32) -> (i32, i32) {
    %c0_i32 = arith.constant 0 : i32
    %c0_i32_0 = arith.constant 0 : i32
    return %arg0, %c0_i32 : i32, i32
  }
  func.func @transform_1(%arg0: i32) -> (i32, i32) {
    %c0_i32 = arith.constant 0 : i32
    %c0_i32_0 = arith.constant 0 : i32
    %c0_i32_1 = arith.constant 0 : i32
    return %c0_i32, %c0_i32_0 : i32, i32
  }
  func.func @transform_2(%arg0: i32) -> (i32, i32) {
    %c0_i32 = arith.constant 0 : i32
    %c0_i32_0 = arith.constant 0 : i32
    %c0_i32_1 = arith.constant 0 : i32
    return %c0_i32, %c0_i32_0 : i32, i32
  }
  func.func @transform_3(%arg0: i32) -> (i32, i32) {
    %c0_i32 = arith.constant 0 : i32
    %c0_i32_0 = arith.constant 0 : i32
    %c0_i32_1 = arith.constant 0 : i32
    return %c0_i32, %c0_i32_0 : i32, i32
  }
  func.func @transform_4(%arg0: i32) -> (i32, i32) {
    %c0_i32 = arith.constant 0 : i32
    %c0_i32_0 = arith.constant 0 : i32
    %c0_i32_1 = arith.constant 0 : i32
    return %c0_i32, %c0_i32_0 : i32, i32
  }
  func.func @transform_5(%arg0: i32) -> (i32, i32) {
    %c0_i32 = arith.constant 0 : i32
    %c0_i32_0 = arith.constant 0 : i32
    %c0_i32_1 = arith.constant 0 : i32
    return %c0_i32, %c0_i32_0 : i32, i32
  }
  func.func @transform_6(%arg0: i32) -> (i32, i32) {
    %c0_i32 = arith.constant 0 : i32
    %c0_i32_0 = arith.constant 0 : i32
    %c0_i32_1 = arith.constant 0 : i32
    return %c0_i32, %c0_i32_0 : i32, i32
  }
  func.func @transform_7(%arg0: i32) -> (i32, i32) {
    %c0_i32 = arith.constant 0 : i32
    %c0_i32_0 = arith.constant 0 : i32
    return %arg0, %c0_i32 : i32, i32
  }
}

</mosaic_0001>

<bundles_post_ra>
// kernel: head_net_forward.1
= control target key start
LH: loop header
LB: loop body
LE: loop exit
PB: predicated region body
PF: predicated region fallthrough
CT: control target
= control target key end

     0   :  { %12 = vsyncpa [#allocation3], 0  ;;  %s609_s24 = smov [#allocation2]   ;;  %s839_s0 = inlined_call_operand.vmem [shape: f32[8,32], index: 0, kind: input, shape index: {}]   ;;  %s840_s1 = inlined_call_operand.vmem [shape: f32[128,32], index: 1, kind: input, shape index: {}]   ;;  %s841_s2 = inlined_call_operand.vmem [shape: f32[1,128], index: 2, kind: input, shape index: {}]   ;;  %s842_s3 = inlined_call_operand.vmem [shape: f32[128,128], index: 3, kind: input, shape index: {}]   ;;  %s843_s4 = inlined_call_operand.vmem [shape: f32[1,128], index: 4, kind: input, shape index: {}]   ;;  %s844_s5 = inlined_call_operand.hbm [shape: f32[128,128], index: 5, kind: input, shape index: {}]   ;;  %s845_s6 = inlined_call_operand.vmem [shape: f32[1,128], index: 6, kind: input, shape index: {}]   ;;  %s846_s7 = inlined_call_operand.vmem [shape: f32[8,128], index: 7, kind: output, shape index: {}]  }
   0x1   :  { %s28_s25 = sshll.u32 %s609_s24, 4  ;;  %s29_s25 = int_to_ptr.vmem [resolvable:$true] %s28_s25 }
   0x2   :  { %s595_s26 = scalar_lea.vmem %s29_s25, 2048  ;;  %p600_p1 = scmp.lt.s32.totalorder %s29_s25, %s29_s25 }
   0x3   :  { %p596_p0 = scmp.ne.s32.totalorder %s29_s25, %s595_s26  ;;  %p601_p2 = scmp.lt.s32.totalorder %s595_s26, %s595_s26 }
   0x5   :  { %p602_p3 = por %p601_p2, %p600_p1 }
   0x7   :  { %p603_p4 = pnand %p602_p3, %p596_p0 }
   0x9   :  { %606 = shalt.err (!%p603_p4)
}
   0xa   :  { %s610_s27 = smov 128   ;;  %s611_s28 = smov 8  }
   0xb   :  { %34 = dma.hbm_to_vmem [thread:$0]  %s844_s5, 2048, %s29_s25, [#allocation3], %s610_s27, %s610_s27, %s611_s28  }
   0xc   :  { %607 = dma.done.wait [#allocation3], 2048  }
   0xd   :  { %608 = vsyncadd [#allocation3], 4294965248  ;;  %v612_v0 = vmov 0.0   ;;  %vm613_vm0 = vmmov 0   ;;  %vm64_vm1 = vcmask 261120   ;;  %v56_v1 = vld [vmem:[%s840_s1 + $0x78] sm:$0xff] }
   0xe   :  { %473 = vmatprep.subr.mxu0 %v612_v0  ;;  %505 = vmatprep.mubr.msk.f32.mxu0 %vm613_vm0, %v612_v0  ;;  %v55_v2 = vld [vmem:[%s840_s1 + $0x70] sm:$0xff]  ;;  %v202_v3 = vld [vmem:[%s842_s3 + $0x78] sm:$0xff]  ;;  %v54_v4 = vld [vmem:[%s840_s1 + $0x68] sm:$0xff] }
   0xf   :  { %508 = vmatprep.subr.mxu1 %v612_v0  ;;  %540 = vmatprep.mubr.msk.f32.mxu1 %vm613_vm0, %v612_v0  ;;  %v201_v5 = vld [vmem:[%s842_s3 + $0x70] sm:$0xff]  ;;  %v53_v6 = vld [vmem:[%s840_s1 + $0x60] sm:$0xff]  ;;  %v200_v7 = vld [vmem:[%s842_s3 + $0x68] sm:$0xff] }
  0x10   :  { %474 = vmatpush3.xpose.msk.msra.mxu0 %vm64_vm1, %v56_v1  ;;  %509 = vmatpush3.xpose.msra.mxu1 %v202_v3  ;;  %v52_v8 = vld [vmem:[%s840_s1 + $0x58] sm:$0xff]  ;;  %v199_v9 = vld [vmem:[%s842_s3 + $0x60] sm:$0xff]  ;;  %v51_v10 = vld [vmem:[%s840_s1 + $0x50] sm:$0xff] }
  0x11   :  { %475 = vmatprep.subr.mxu0 %v612_v0  ;;  %510 = vmatprep.subr.mxu1 %v612_v0  ;;  %v198_v11 = vld [vmem:[%s842_s3 + $0x58] sm:$0xff]  ;;  %v50_v12 = vld [vmem:[%s840_s1 + $0x48] sm:$0xff]  ;;  %v197_v13 = vld [vmem:[%s842_s3 + $0x50] sm:$0xff] }
  0x12   :  { %v49_v14 = vld [vmem:[%s840_s1 + $0x40] sm:$0xff]  ;;  %v196_v15 = vld [vmem:[%s842_s3 + $0x48] sm:$0xff]  ;;  %v48_v16 = vld [vmem:[%s840_s1 + $0x38] sm:$0xff] }
  0x13   :  { %v195_v17 = vld [vmem:[%s842_s3 + $0x40] sm:$0xff]  ;;  %v47_v18 = vld [vmem:[%s840_s1 + $0x30] sm:$0xff]  ;;  %v194_v19 = vld [vmem:[%s842_s3 + $0x38] sm:$0xff] }
  0x14   :  { %476 = vmatpush3.xpose.msk.msra.mxu0 %vm64_vm1, %v55_v2  ;;  %511 = vmatpush3.xpose.msra.mxu1 %v201_v5  ;;  %v46_v20 = vld [vmem:[%s840_s1 + $0x28] sm:$0xff]  ;;  %v193_v21 = vld [vmem:[%s842_s3 + $0x30] sm:$0xff]  ;;  %v45_v22 = vld [vmem:[%s840_s1 + $0x20] sm:$0xff] }
  0x15   :  { %477 = vmatprep.subr.mxu0 %v612_v0  ;;  %512 = vmatprep.subr.mxu1 %v612_v0  ;;  %v192_v23 = vld [vmem:[%s842_s3 + $0x28] sm:$0xff]  ;;  %v44_v24 = vld [vmem:[%s840_s1 + $0x18] sm:$0xff]  ;;  %v191_v25 = vld [vmem:[%s842_s3 + $0x20] sm:$0xff] }
  0x16   :  { %v43_v26 = vld [vmem:[%s840_s1 + $0x10] sm:$0xff]  ;;  %v190_v27 = vld [vmem:[%s842_s3 + $0x18] sm:$0xff]  ;;  %v42_v28 = vld [vmem:[%s840_s1 + $0x8] sm:$0xff] }
  0x17   :  { %v189_v29 = vld [vmem:[%s842_s3 + $0x10] sm:$0xff]  ;;  %v41_v30 = vld [vmem:[%s840_s1] sm:$0xff]  ;;  %v188_v31 = vld [vmem:[%s842_s3 + $0x8] sm:$0xff] }
  0x18   :  { %478 = vmatpush3.xpose.msk.msra.mxu0 %vm64_vm1, %v54_v4  ;;  %513 = vmatpush3.xpose.msra.mxu1 %v200_v7  ;;  %v40_v32 = vld [vmem:[%s839_s0] sm:$0xff]  ;;  %v296_v34 = vld [vmem:[#allocation2 + $0x78] sm:$0xff]  ;;  %v295_v35 = vld [vmem:[#allocation2 + $0x70] sm:$0xff] }
  0x19   :  { %479 = vmatprep.subr.mxu0 %v612_v0  ;;  %514 = vmatprep.subr.mxu1 %v612_v0  ;;  %v187_v33 = vld [vmem:[%s842_s3] sm:$0xff]  ;;  %v294_v36 = vld [vmem:[#allocation2 + $0x68] sm:$0xff]  ;;  %v292_v38 = vld [vmem:[#allocation2 + $0x58] sm:$0xff] }
  0x1a   :  { %v293_v37 = vld [vmem:[#allocation2 + $0x60] sm:$0xff]  ;;  %v291_v39 = vld [vmem:[#allocation2 + $0x50] sm:$0xff]  ;;  %v290_v40 = vld [vmem:[#allocation2 + $0x48] sm:$0xff] }
  0x1b   :  { %v289_v41 = vld [vmem:[#allocation2 + $0x40] sm:$0xff]  ;;  %v288_v42 = vld [vmem:[#allocation2 + $0x38] sm:$0xff]  ;;  %v287_v43 = vld [vmem:[#allocation2 + $0x30] sm:$0xff] }
  0x1c   :  { %480 = vmatpush3.xpose.msk.msra.mxu0 %vm64_vm1, %v53_v6  ;;  %515 = vmatpush3.xpose.msra.mxu1 %v199_v9  ;;  %v286_v44 = vld [vmem:[#allocation2 + $0x28] sm:$0xff]  ;;  %v285_v45 = vld [vmem:[#allocation2 + $0x20] sm:$0xff]  ;;  %v284_v46 = vld [vmem:[#allocation2 + $0x18] sm:$0xff]  ;;  %v374_v6 = vlaneseq }
  0x1d   :  { %481 = vmatprep.subr.mxu0 %v612_v0  ;;  %516 = vmatprep.subr.mxu1 %v612_v0  ;;  %v283_v47 = vld [vmem:[#allocation2 + $0x10] sm:$0xff]  ;;  %v282_v48 = vld [vmem:[#allocation2 + $0x8] sm:$0xff]  ;;  %v402_v49 = vld [vmem:[%s841_s2] ss:$0 sm:$0xff] }
  0x1e   :  { %v281_v54 = vld [vmem:[#allocation2] sm:$0xff] }
  0x1f   :  { %v420_v55 = vld [vmem:[%s843_s4] ss:$0 sm:$0xff] }
  0x20   :  { %482 = vmatpush3.xpose.msk.msra.mxu0 %vm64_vm1, %v52_v8  ;;  %517 = vmatpush3.xpose.msra.mxu1 %v198_v11  ;;  %v421_v60 = vld [vmem:[%s845_s6] ss:$0 sm:$0xff]  ;;  %v375_v8 = vand.u32 127, %v374_v6 }
  0x21   :  { %483 = vmatprep.subr.mxu0 %v612_v0  ;;  %518 = vmatprep.subr.mxu1 %v612_v0 }
  0x22   :  { %vm376_vm2 = vcmp.ge.s32.totalorder %v375_v8, 4  ;;  %vm377_vm3 = vcmp.lt.s32.totalorder %v375_v8, 8 }
  0x23   :  { %vm378_vm5 = vmand %vm376_vm2, %vm377_vm3 }
  0x24   :  { %484 = vmatpush3.xpose.msk.msra.mxu0 %vm64_vm1, %v51_v10  ;;  %519 = vmatpush3.xpose.msra.mxu1 %v197_v13 }
  0x25   :  { %485 = vmatprep.subr.mxu0 %v612_v0  ;;  %520 = vmatprep.subr.mxu1 %v612_v0 }
  0x28   :  { %486 = vmatpush3.xpose.msk.msra.mxu0 %vm64_vm1, %v50_v12  ;;  %521 = vmatpush3.xpose.msra.mxu1 %v196_v15 }
  0x29   :  { %487 = vmatprep.subr.mxu0 %v612_v0  ;;  %522 = vmatprep.subr.mxu1 %v612_v0 }
  0x2c   :  { %488 = vmatpush3.xpose.msk.msra.mxu0 %vm64_vm1, %v49_v14  ;;  %523 = vmatpush3.xpose.msra.mxu1 %v195_v17 }
  0x2d   :  { %489 = vmatprep.subr.mxu0 %v612_v0  ;;  %524 = vmatprep.subr.mxu1 %v612_v0 }
  0x30   :  { %490 = vmatpush3.xpose.msk.msra.mxu0 %vm64_vm1, %v48_v16  ;;  %525 = vmatpush3.xpose.msra.mxu1 %v194_v19 }
  0x31   :  { %491 = vmatprep.subr.mxu0 %v612_v0  ;;  %526 = vmatprep.subr.mxu1 %v612_v0 }
  0x34   :  { %492 = vmatpush3.xpose.msk.msra.mxu0 %vm64_vm1, %v47_v18  ;;  %527 = vmatpush3.xpose.msra.mxu1 %v193_v21 }
  0x35   :  { %493 = vmatprep.subr.mxu0 %v612_v0  ;;  %528 = vmatprep.subr.mxu1 %v612_v0 }
  0x38   :  { %494 = vmatpush3.xpose.msk.msra.mxu0 %vm64_vm1, %v46_v20  ;;  %529 = vmatpush3.xpose.msra.mxu1 %v192_v23 }
  0x39   :  { %495 = vmatprep.subr.mxu0 %v612_v0  ;;  %530 = vmatprep.subr.mxu1 %v612_v0 }
  0x3c   :  { %496 = vmatpush3.xpose.msk.msra.mxu0 %vm64_vm1, %v45_v22  ;;  %531 = vmatpush3.xpose.msra.mxu1 %v191_v25 }
  0x3d   :  { %497 = vmatprep.subr.mxu0 %v612_v0  ;;  %532 = vmatprep.subr.mxu1 %v612_v0 }
  0x40   :  { %498 = vmatpush3.xpose.msk.msra.mxu0 %vm64_vm1, %v44_v24  ;;  %533 = vmatpush3.xpose.msra.mxu1 %v190_v27 }
  0x41   :  { %499 = vmatprep.subr.mxu0 %v612_v0  ;;  %534 = vmatprep.subr.mxu1 %v612_v0 }
  0x44   :  { %500 = vmatpush3.xpose.msk.msra.mxu0 %vm64_vm1, %v43_v26  ;;  %535 = vmatpush3.xpose.msra.mxu1 %v189_v29 }
  0x45   :  { %501 = vmatprep.subr.mxu0 %v612_v0  ;;  %536 = vmatprep.subr.mxu1 %v612_v0 }
  0x48   :  { %502 = vmatpush3.xpose.msk.msra.mxu0 %vm64_vm1, %v42_v28  ;;  %537 = vmatpush3.xpose.msra.mxu1 %v188_v31 }
  0x49   :  { %503 = vmatprep.subr.mxu0 %v612_v0  ;;  %538 = vmatprep.subr.mxu1 %v612_v0 }
  0x4c   :  { %504 = vmatpush3.xpose.msk.msra.mxu0 %vm64_vm1, %v41_v30  ;;  %539 = vmatpush3.xpose.msra.mxu1 %v187_v33 }
  0x4d   :  { %543 = vmatprep.subr.mxu0 %v612_v0 }
  0x4f   :  { %506 = vmatmul.mubr.msk.f32.vlgmr.msra.gmra.mxu0 %vm64_vm1, %v40_v32 }
  0x50   :  { %575 = vmatprep.mubr.msk.f32.mxu0 %vm613_vm0, %v612_v0  ;;  %544 = vmatpush3.xpose.msra.mxu0 %v296_v34 }
  0x51   :  { %545 = vmatprep.subr.mxu0 %v612_v0 }
  0x54   :  { %546 = vmatpush3.xpose.msra.mxu0 %v295_v35 }
  0x55   :  { %547 = vmatprep.subr.mxu0 %v612_v0 }
  0x58   :  { %548 = vmatpush3.xpose.msra.mxu0 %v294_v36 }
  0x59   :  { %549 = vmatprep.subr.mxu0 %v612_v0 }
  0x5c   :  { %550 = vmatpush3.xpose.msra.mxu0 %v293_v37 }
  0x5d   :  { %551 = vmatprep.subr.mxu0 %v612_v0 }
  0x60   :  { %552 = vmatpush3.xpose.msra.mxu0 %v292_v38 }
  0x61   :  { %553 = vmatprep.subr.mxu0 %v612_v0 }
  0x64   :  { %554 = vmatpush3.xpose.msra.mxu0 %v291_v39 }
  0x65   :  { %555 = vmatprep.subr.mxu0 %v612_v0 }
  0x68   :  { %556 = vmatpush3.xpose.msra.mxu0 %v290_v40 }
  0x69   :  { %557 = vmatprep.subr.mxu0 %v612_v0 }
  0x6c   :  { %558 = vmatpush3.xpose.msra.mxu0 %v289_v41 }
  0x6d   :  { %559 = vmatprep.subr.mxu0 %v612_v0 }
  0x70   :  { %560 = vmatpush3.xpose.msra.mxu0 %v288_v42 }
  0x71   :  { %561 = vmatprep.subr.mxu0 %v612_v0 }
  0x74   :  { %562 = vmatpush3.xpose.msra.mxu0 %v287_v43 }
  0x75   :  { %563 = vmatprep.subr.mxu0 %v612_v0 }
  0x78   :  { %564 = vmatpush3.xpose.msra.mxu0 %v286_v44 }
  0x79   :  { %565 = vmatprep.subr.mxu0 %v612_v0 }
  0x7c   :  { %566 = vmatpush3.xpose.msra.mxu0 %v285_v45 }
  0x7d   :  { %567 = vmatprep.subr.mxu0 %v612_v0 }
  0x80   :  { %568 = vmatpush3.xpose.msra.mxu0 %v284_v46 }
  0x81   :  { %569 = vmatprep.subr.mxu0 %v612_v0 }
  0x84   :  { %570 = vmatpush3.xpose.msra.mxu0 %v283_v47 }
  0x85   :  { %571 = vmatprep.subr.mxu0 %v612_v0 }
  0x88   :  { %572 = vmatpush3.xpose.msra.mxu0 %v282_v48 }
  0x89   :  { %573 = vmatprep.subr.mxu0 %v612_v0 }
  0x8c   :  { %574 = vmatpush3.xpose.msra.mxu0 %v281_v54 }
 0x10f   :  { %v182_v50 = vpop.f32.mrf.mxu0 }
 0x110   :  { %v183_v51 = vadd.f32 %v402_v49, %v182_v50 }
 0x111   :  { %v507_v52 = vpop.f32.mrf.mxu0 }
 0x112   :  { %v186_v53 = vmax.f32 %v183_v51, 0.0 }
 0x114   :  { %541 = vmatmul.mubr.f32.vlgmr.msra.gmra.mxu1 %v186_v53 }
 0x1d4   :  { %v276_v56 = vpop.f32.mrf.mxu1 }
 0x1d5   :  { %v277_v57 = vadd.f32 %v420_v55, %v276_v56 }
 0x1d6   :  { %v542_v58 = vpop.f32.mrf.mxu1 }
 0x1d7   :  { %v280_v59 = vmax.f32 %v277_v57, 0.0 }
 0x1d9   :  { %576 = vmatmul.mubr.f32.vlgmr.msra.gmra.mxu0 %v280_v59 }
 0x299   :  { %v370_v61 = vpop.f32.mrf.mxu0 }
 0x29a   :  { %v371_v62 = vadd.f32 %v421_v60, %v370_v61 }
 0x29b   :  { %v577_v63 = vpop.f32.mrf.mxu0 }
 0x29c   :  { %v380_v0 = vand.u32 2147483647, %v371_v62  ;;  %v379_v13 = vmax.f32 %v371_v62, 0.0 }
 0x29e   :  { %v381_v1 = vsub.f32 0.0, %v380_v0 }
 0x2a0   :  { %v382_v2 = vmul.f32 1.442695, %v381_v1 }
 0x2a2   :  { %583 = vpow2.f32 %v382_v2 }
 0x2af   :  { %v584_v3 = vpop.eup %583 }
 0x2b0   :  { %v384_v4 = vadd.f32 1.0, %v584_v3  ;;  %v387_v5 = vmul.f32 -0.5, %v584_v3  ;;  %v390_v9 = vand.u32 2147483647, %v584_v3 }
 0x2b2   :  { %585 = vlog2.f32 %v384_v4  ;;  %v388_v7 = vadd.f32 1.0, %v387_v5  ;;  %vm391_vm4 = vcmp.lt.f32.partialorder %v390_v9, 0.0004427343 }
 0x2b4   :  { %v389_v12 = vmul.f32 %v584_v3, %v388_v7 }
 0x2bf   :  { %v586_v10 = vpop.eup %585 }
 0x2c0   :  { %v386_v11 = vmul.f32 0.6931472, %v586_v10 }
 0x2c2   :  { %v392_v14 = vsel %vm391_vm4, %v389_v12, %v386_v11 }
 0x2c3   :  { %v393_v15 = vadd.f32 %v392_v14, %v379_v13 }
 0x2c5   :  { %v394_v16 = vadd.f32 1e-05, %v393_v15 }
 0x2c7   :  { %v395_v17 = vsel %vm378_vm5, %v394_v16, %v371_v62 }
 0x2c8   :  { %396 = vst [vmem:[%s846_s7] sm:$0xff] %v395_v17 }
 0x2c9   :  { %401 = vsyncpa [#allocation3], 1 }

</bundles_post_ra>
